<compile_context>
chip_gen: v5e
topology: v5e:2x2
jax: 0.10.0
libtpu: 0.0.40
codegen_flags: <defaults>
</compile_context>

<pallas_src>
import math
from functools import partial

import jax
import jax.numpy as jnp
from jax import lax
from jax.experimental import pallas as pl
from jax.experimental.pallas import tpu as pltpu


def _rows_kernel(x_ref, out_ref, *, half_dim, neg_log_scale):
    # Lane-aligned layout (half_dim % 128 == 0).
    # x_ref:   (tile_b, 1)        f32
    # out_ref: (tile_b, 2*half_dim) f32
    iota = lax.broadcasted_iota(jnp.int32, (1, half_dim), 1).astype(jnp.float32)
    freqs = jnp.exp(iota * neg_log_scale)          # (1, half_dim), tiny per-step cost
    emb = x_ref[...] * freqs                       # (tile_b, half_dim)
    # Two lane-aligned static-sliced stores (no lane-axis concat, no temp).
    out_ref[:, :half_dim] = jnp.sin(emb)
    out_ref[:, half_dim:] = jnp.cos(emb)


def _cols_kernel(x_ref, out_ref, *, half_dim, neg_log_scale):
    # Transposed (lane-dense) layout: B on the lane axis.
    # x_ref:   (1, tile_b)          f32  (lane-major timesteps)
    # out_ref: (2*half_dim, tile_b) f32  (sin rows on top, cos rows below)
    iota = lax.broadcasted_iota(jnp.int32, (half_dim, 1), 0).astype(jnp.float32)
    freqs = jnp.exp(iota * neg_log_scale)          # (half_dim, 1)
    emb = freqs * x_ref[...]                       # (half_dim, tile_b)
    out_ref[:half_dim, :] = jnp.sin(emb)           # full-width unmasked stores
    out_ref[half_dim:, :] = jnp.cos(emb)


def sinusoidal_pos_emb(x, dim):
    """x: (B,) float timesteps -> (B, dim) float32 embedding (sin || cos)."""
    if dim % 2 != 0:
        raise ValueError("dim must be even (PyTorch module writes 2*(dim//2) columns)")
    half_dim = dim // 2
    if half_dim < 2:
        raise ValueError("dim must be >= 4 ((half_dim - 1) is a denominator)")

    B = x.shape[0]
    x = x.astype(jnp.float32)
    neg_log_scale = -(math.log(10000.0) / (half_dim - 1))

    lane_aligned = (half_dim % 128) == 0
    # Granularity of the B axis: sublane (8) in the row layout, lane (128) in
    # the transposed layout.
    gran = 8 if lane_aligned else 128
    bytes_per_row = 4 * dim

    # ~1 MiB output tiles (amortize ~0.35us/grid-step overhead), capped at
    # 4 MiB so 2x double-buffered output + inputs stay inside v5e's 16 MiB
    # default scoped VMEM (v6e/v7x 32 MiB scoped, v7x 64 MiB physical).
    tile_b = max((1 << 20) // bytes_per_row, 1024)
    tile_b = min(tile_b, max((4 << 20) // bytes_per_row, gran))
    # Big problems: force >= 2 grid steps so ("parallel",) can use both of
    # v7x's TensorCores.
    if B * bytes_per_row >= (1 << 19):
        tile_b = min(tile_b, pl.cdiv(B, 2))
    tile_b = min(tile_b, B)
    tile_b = pl.cdiv(max(tile_b, 1), gran) * gran
    # Prefer a tile that divides B (avoids padding + a post-call out[:B] slice,
    # which would be an extra full read+write of a write-bound output).
    if B % gran == 0 and B % tile_b != 0:
        for cand in range(tile_b, tile_b // 2, -gran):
            if B % cand == 0:
                tile_b = cand
                break

    b_pad = pl.cdiv(B, tile_b) * tile_b
    grid = (b_pad // tile_b,)
    params = pltpu.CompilerParams(dimension_semantics=("parallel",))
    cost = pl.CostEstimate(
        flops=b_pad * dim,
        transcendentals=b_pad * dim + grid[0] * half_dim,
        bytes_accessed=4 * (b_pad + b_pad * dim),
    )

    if lane_aligned:
        # (B, dim) output is already lane-aligned: sin at lane 0, cos at a
        # multiple-of-128 lane offset.  No wrapper transpose needed.
        x2d = x.reshape(B, 1)
        if b_pad != B:
            x2d = jnp.pad(x2d, ((0, b_pad - B), (0, 0)))
        out = pl.pallas_call(
            partial(_rows_kernel, half_dim=half_dim, neg_log_scale=neg_log_scale),
            out_shape=jax.ShapeDtypeStruct((b_pad, dim), jnp.float32),
            grid_spec=pltpu.PrefetchScalarGridSpec(
                num_scalar_prefetch=0,
                grid=grid,
                in_specs=[pl.BlockSpec((tile_b, 1), lambda i: (i, 0))],
                out_specs=pl.BlockSpec((tile_b, dim), lambda i: (i, 0)),
            ),
            compiler_params=params,
            cost_estimate=cost,
        )(x2d)
        return out if b_pad == B else out[:B]

    # Transposed (lane-dense) path: compute (dim, B) with B on lanes, then
    # transpose back in the wrapper.
    x_row = x.reshape(1, B)
    if b_pad != B:
        x_row = jnp.pad(x_row, ((0, 0), (0, b_pad - B)))
    out_t = pl.pallas_call(
        partial(_cols_kernel, half_dim=half_dim, neg_log_scale=neg_log_scale),
        out_shape=jax.ShapeDtypeStruct((dim, b_pad), jnp.float32),
        grid_spec=pltpu.PrefetchScalarGridSpec(
            num_scalar_prefetch=0,
            grid=grid,
            in_specs=[pl.BlockSpec((1, tile_b), lambda i: (0, i))],
            out_specs=pl.BlockSpec((dim, tile_b), lambda i: (0, i)),
        ),
        compiler_params=params,
        cost_estimate=cost,
    )(x_row)
    out_t = out_t if b_pad == B else out_t[:, :B]
    return out_t.T


def _reference(x, dim):
    half_dim = dim // 2
    emb = math.log(10000.0) / (half_dim - 1)
    emb = jnp.exp(jnp.arange(half_dim, dtype=jnp.float32) * -emb)
    emb = x[:, None].astype(jnp.float32) * emb[None, :]
    return jnp.concatenate([jnp.sin(emb), jnp.cos(emb)], axis=-1)


if __name__ == "__main__":
    key = jax.random.PRNGKey(0)

    # Diffusion timesteps: positive floats.  Tolerance note: freqs are computed
    # with the in-kernel exp while the reference uses XLA's exp; a couple-ulp
    # difference is amplified by the timestep magnitude inside sin/cos, so we
    # compare at 1e-3 on values that live in [-1, 1].
    B, dim = 8, 32          # exercises the lane-dense transposed path
    x = jax.random.uniform(key, (B,), dtype=jnp.float32, minval=0.0, maxval=100.0)
    out = jax.block_until_ready(sinusoidal_pos_emb(x, dim))
    ref = _reference(x, dim)
    assert out.shape == (B, dim)
    assert jnp.allclose(out, ref, atol=1e-3, rtol=1e-4), "mismatch vs reference (dim=32)"

    B2, dim2 = 16, 256      # exercises the lane-aligned (B, dim) path
    x2 = jax.random.uniform(jax.random.PRNGKey(1), (B2,), dtype=jnp.float32,
                            minval=0.0, maxval=100.0)
    out2 = jax.block_until_ready(sinusoidal_pos_emb(x2, dim2))
    ref2 = _reference(x2, dim2)
    assert out2.shape == (B2, dim2)
    assert jnp.allclose(out2, ref2, atol=1e-3, rtol=1e-4), "mismatch vs reference (dim=256)"

    print("KERNEL_OK")
</pallas_src>

<mosaic_0001>
module attributes {stable_mosaic.version = 11 : i64} {
  func.func @_cols_kernel(%arg0: i32, %arg1: memref<1x128xf32, #tpu.memory_space<vmem>>, %arg2: memref<32x128xf32, #tpu.memory_space<vmem>>) attributes {dimension_semantics = [#tpu.dimension_semantics<parallel>], iteration_bounds = array<i64: 1>, scalar_prefetch = 0 : i64, scratch_operands = 0 : i64, tpu.core_type = #tpu.core_type<tc>, window_params = [{transform_indices = @transform_0, window_bounds = array<i64: 1, 128>}, {transform_indices = @transform_1, window_bounds = array<i64: 32, 128>}]} {
    %0 = tpu.iota {dimensions = array<i32: 0>} : vector<16x1xi32>
    %1 = arith.sitofp %0 : vector<16x1xi32> to vector<16x1xf32>
    %cst = arith.constant -0.614022672 : f32
    %2 = vector.broadcast %cst : f32 to vector<16x1xf32>
    %3 = arith.mulf %1, %2 : vector<16x1xf32>
    %4 = math.exp %3 : vector<16x1xf32>
    %c0 = arith.constant 0 : index
    %c0_0 = arith.constant 0 : index
    %5 = vector.load %arg1[%c0, %c0_0] : memref<1x128xf32, #tpu.memory_space<vmem>>, vector<1x128xf32>
    %6 = vector.broadcast %4 : vector<16x1xf32> to vector<16x128xf32>
    %7 = vector.broadcast %5 : vector<1x128xf32> to vector<16x128xf32>
    %8 = arith.mulf %6, %7 : vector<16x128xf32>
    %9 = math.sin %8 : vector<16x128xf32>
    %c0_1 = arith.constant 0 : index
    %c0_2 = arith.constant 0 : index
    %10 = vector.load %arg2[%c0_1, %c0_2] : memref<32x128xf32, #tpu.memory_space<vmem>>, vector<16x128xf32>
    tpu.vector_store %arg2[%c0_1, %c0_2], %9 {strides = array<i32>} : memref<32x128xf32, #tpu.memory_space<vmem>>, vector<16x128xf32>,
    %11 = math.cos %8 : vector<16x128xf32>
    %c16 = arith.constant 16 : index
    %c0_3 = arith.constant 0 : index
    %12 = vector.load %arg2[%c16, %c0_3] : memref<32x128xf32, #tpu.memory_space<vmem>>, vector<16x128xf32>
    tpu.vector_store %arg2[%c16, %c0_3], %11 {strides = array<i32>} : memref<32x128xf32, #tpu.memory_space<vmem>>, vector<16x128xf32>,
    return
  }
  func.func @transform_0(%arg0: i32) -> (i32, i32) {
    %c0_i32 = arith.constant 0 : i32
    %c0_i32_0 = arith.constant 0 : i32
    return %c0_i32, %arg0 : i32, i32
  }
  func.func @transform_1(%arg0: i32) -> (i32, i32) {
    %c0_i32 = arith.constant 0 : i32
    %c0_i32_0 = arith.constant 0 : i32
    return %c0_i32, %arg0 : i32, i32
  }
}

</mosaic_0001>

<bundles_post_ra>
// kernel: tpu_custom_call.1
= control target key start
LH: loop header
LB: loop body
LE: loop exit
PB: predicated region body
PF: predicated region fallthrough
CT: control target
= control target key end

     0   :  { %6 = vsyncpa [#allocation3], 0  ;;  %s921_s0 = inlined_call_operand.hbm [shape: f32[1,128], index: 0, kind: input, shape index: {}]   ;;  %s922_s1 = inlined_call_operand.hbm [shape: f32[32,128], index: 1, kind: output, shape index: {}]  }
   0x1   :  { %7 = vsyncpa [#allocation4], 0  ;;  %s13_s8 = sshll.u32 %s921_s0, 4  ;;  %s761_s9 = smov [#allocation2]   ;;  %s14_s8 = int_to_ptr.hbm [resolvable:$true] %s13_s8 }
   0x2   :  { %s15_s10 = sshll.u32 %s761_s9, 4  ;;  %s16_s10 = int_to_ptr.vmem [resolvable:$true] %s15_s10 }
   0x3   :  { %18 = dma.hbm_to_vmem [thread:$0]  %s14_s8, 16, %s16_s10, [#allocation3]  }
   0x4   :  { %757 = dma.done.wait [#allocation3], 16  }
   0x5   :  { %758 = vsyncadd [#allocation3], 4294967280  ;;  %v23_v0 = vlaneseq  ;;  %v704_v9 = vld [vmem:[#allocation2] ss:$0 sm:$0xff]  ;;  %v762_v33 = vmov 683565275  }
   0x6   :  { %v763_v35 = vmov 2475754826   ;;  %v764_v37 = vmov 2131351028   ;;  %v765_v39 = vmov 2102212464  }
   0x7   :  { %v24_v1 = vshrl.u32 %v23_v0, 7  ;;  %v766_v41 = vmov 920167782   ;;  %v767_v50 = vmov 1326507024   ;;  %s769_s0 = smov [#allocation5]  }
   0x8   :  { %s666_s11 = sshll.u32 %s769_s0, 4  ;;  %s668_s14 = sshll.u32 %s922_s1, 4  ;;  %s667_s11 = int_to_ptr.vmem [resolvable:$true] %s666_s11  ;;  %s669_s14 = int_to_ptr.hbm [resolvable:$true] %s668_s14 }
   0x9   :  { %v26_v2 = vcvt.s32.f32 %v24_v1  ;;  %v25_v3 = vadd.s32 8, %v24_v1  ;;  %s770_s15 = smov 128   ;;  %s771_s16 = smov 8  }
   0xb   :  { %v28_v4 = vmul.f32 -0.6140227, %v26_v2  ;;  %v27_v5 = vcvt.s32.f32 %v25_v3 }
   0xd   :  { %v30_v6 = vmul.f32 1.442695, %v28_v4  ;;  %v29_v7 = vmul.f32 -0.6140227, %v27_v5 }
   0xf   :  { %705 = vpow2.f32 %v30_v6  ;;  %v32_v8 = vmul.f32 1.442695, %v29_v7 }
  0x11   :  { %707 = vpow2.f32 %v32_v8 }
  0x15   :  { %v706_v10 = vpop.eup %705 }
  0x16   :  { %v785_v11 = vmul.f32 %v706_v10, %v704_v9 }
  0x17   :  { %v708_v12 = vpop.eup %707 }
  0x18   :  { %v40_v13 = vand.u32 2147483647, %v785_v11  ;;  %v43_v14 = vand.u32 2139095040, %v785_v11  ;;  %v789_v15 = vmul.f32 %v708_v12, %v704_v9 }
  0x1a   :  { %v44_v16 = vshrl.u32 %v43_v14, 23  ;;  %v47_v17 = vand.u32 8388607, %v40_v13  ;;  %v198_v18 = vand.u32 2139095040, %v789_v15  ;;  %v195_v19 = vand.u32 2147483647, %v789_v15 }
  0x1c   :  { %v681_v20 = vadd.s32 4294967169, %v44_v16  ;;  %v199_v21 = vshrl.u32 %v198_v18, 23  ;;  %v48_v22 = vor.u32 8388608, %v47_v17  ;;  %v202_v25 = vand.u32 8388607, %v195_v19 }
  0x1e   :  { %v50_v23 = vadd.s32 1, %v681_v20  ;;  %v684_v24 = vadd.s32 4294967169, %v199_v21  ;;  %v797_v28 = vshll.u32 %v48_v22, 8  ;;  %v203_v31 = vor.u32 8388608, %v202_v25 }
  0x20   :  { %vm51_vm0 = vcmp.gt.s32.totalorder %v50_v23, 0  ;;  %v205_v26 = vadd.s32 1, %v684_v24  ;;  %v89_v43 = vand.u32 65535, %v797_v28  ;;  %v90_v4 = vshrl.u32 %v797_v28, 16 }
  0x21   :  { %v52_v27 = vsel %vm51_vm0, %v50_v23, 0  ;;  %v813_v5 = vshll.u32 %v203_v31, 8 }
  0x22   :  { %v54_v29 = vand.u32 31, %v52_v27  ;;  %vm206_vm1 = vcmp.gt.s32.totalorder %v205_v26, 0  ;;  %v53_v30 = vshrl.u32 %v52_v27, 5 }
  0x23   :  { %v207_v44 = vsel %vm206_vm1, %v205_v26, 0 }
  0x24   :  { %v55_v32 = vsub.s32 32, %v54_v29  ;;  %v57_v34 = vshll.u32 %v762_v33, %v54_v29  ;;  %v60_v36 = vshll.u32 %v763_v35, %v54_v29  ;;  %v63_v38 = vshll.u32 %v764_v37, %v54_v29 }
  0x25   :  { %v66_v40 = vshll.u32 %v765_v39, %v54_v29  ;;  %v69_v42 = vshll.u32 %v766_v41, %v54_v29  ;;  %vm72_vm2 = vcmp.lt.s32.totalorder %v53_v30, 1  ;;  %vm73_vm3 = vcmp.lt.s32.totalorder %v53_v30, 2 }
  0x26   :  { %v56_v45 = vshrl.u32 %v762_v33, %v55_v32  ;;  %v58_v46 = vshrl.u32 %v763_v35, %v55_v32  ;;  %v61_v47 = vshrl.u32 %v764_v37, %v55_v32  ;;  %v64_v48 = vshrl.u32 %v765_v39, %v55_v32 }
  0x27   :  { %v67_v49 = vshrl.u32 %v766_v41, %v55_v32  ;;  %v70_v51 = vshrl.u32 %v767_v50, %v55_v32  ;;  %vm75_vm4 = vcmp.lt.s32.totalorder %v53_v30, 4  ;;  %vm74_vm5 = vcmp.lt.s32.totalorder %v53_v30, 3 }
  0x28   :  { %v59_v52 = vor.u32 %v58_v46, %v57_v34  ;;  %v62_v53 = vor.u32 %v61_v47, %v60_v36  ;;  %v65_v54 = vor.u32 %v64_v48, %v63_v38  ;;  %v807_v57 = vand.u32 31, %v207_v44 }
  0x29   :  { %v68_v55 = vor.u32 %v67_v49, %v66_v40  ;;  %v71_v56 = vor.u32 %v70_v51, %v69_v42  ;;  %v820_v9 = vshrl.u32 %v207_v44, 5  ;;  %v768_v47 = vmov 0  }
  0x2a   :  { %v76_v58 = vsel %vm72_vm2, %v56_v45, %v59_v52  ;;  %v77_v59 = vsel %vm75_vm4, %v65_v54, 2102212464  ;;  %v80_v60 = vsel %vm72_vm2, %v59_v52, %v62_v53  ;;  %v84_v61 = vsel %vm72_vm2, %v62_v53, %v65_v54 }
  0x2b   :  { %v78_v62 = vsel %vm74_vm5, %v62_v53, %v77_v59  ;;  %v81_v63 = vsel %vm75_vm4, %v68_v55, 920167782  ;;  %v85_v0 = vsel %vm75_vm4, %v71_v56, 1326507024  ;;  %v810_v1 = vsub.s32 32, %v807_v57 }
  0x2c   :  { %v82_v2 = vsel %vm74_vm5, %v65_v54, %v81_v63  ;;  %v86_v3 = vsel %vm74_vm5, %v68_v55, %v85_v0  ;;  %v816_v6 = vsel %vm73_vm3, %v76_v58, %v78_v62  ;;  %v212_v17 = vshll.u32 %v762_v33, %v807_v57 }
  0x2d   :  { %v83_v7 = vsel %vm73_vm3, %v80_v60, %v82_v2  ;;  %v87_v8 = vsel %vm73_vm3, %v84_v61, %v86_v3  ;;  %v213_v18 = vshrl.u32 %v763_v35, %v810_v1  ;;  %v215_v20 = vshll.u32 %v763_v35, %v807_v57 }
  0x2e   :  { %v91_v10 = vand.u32 65535, %v87_v8  ;;  %v92_v12 = vshrl.u32 %v87_v8, 16  ;;  %v113_v14 = vand.u32 65535, %v83_v7  ;;  %v114_v16 = vshrl.u32 %v83_v7, 16 }
  0x2f   :  { %v216_v21 = vshrl.u32 %v764_v37, %v810_v1  ;;  %v218_v25 = vshll.u32 %v764_v37, %v807_v57  ;;  %v828_v46 = vor.u32 %v213_v18, %v212_v17  ;;  %v221_v52 = vshll.u32 %v765_v39, %v807_v57 }
  0x30   :  { %v93_v22 = vmul.u32 %v91_v10, %v89_v43  ;;  %v94_v23 = vmul.u32 %v92_v12, %v89_v43  ;;  %v95_v24 = vmul.u32 %v91_v10, %v90_v4  ;;  %v96_v26 = vmul.u32 %v92_v12, %v90_v4 }
  0x31   :  { %v115_v27 = vmul.u32 %v113_v14, %v89_v43  ;;  %v116_v29 = vmul.u32 %v114_v16, %v89_v43  ;;  %v117_v30 = vmul.u32 %v113_v14, %v90_v4  ;;  %v118_v36 = vmul.u32 %v114_v16, %v90_v4 }
  0x32   :  { %v97_v31 = vshll.u32 %v94_v23, 16  ;;  %v98_v32 = vshrl.u32 %v94_v23, 16  ;;  %v99_v34 = vshll.u32 %v95_v24, 16  ;;  %v100_v38 = vshrl.u32 %v95_v24, 16 }
  0x33   :  { %v119_v40 = vshll.u32 %v116_v29, 16  ;;  %v120_v42 = vshrl.u32 %v116_v29, 16  ;;  %v121_v44 = vshll.u32 %v117_v30, 16  ;;  %v122_v45 = vshrl.u32 %v117_v30, 16 }
  0x34   :  { %vm101_vm6 = vc.u32 %v93_v22, %v97_v31  ;;  %v103_v35 = vadd.s32 %v97_v31, %v93_v22  ;;  %v219_v43 = vshrl.u32 %v765_v39, %v810_v1  ;;  %v217_v55 = vor.u32 %v216_v21, %v215_v20 }
  0x35   :  { %v102_v37 = vsel %vm101_vm6, 1, %v768_v47  ;;  %vm123_vm7 = vc.u32 %v115_v27, %v119_v40  ;;  %v125_v48 = vadd.s32 %v119_v40, %v115_v27  ;;  %v222_v60 = vshrl.u32 %v766_v41, %v810_v1 }
  0x36   :  { %v104_v49 = vadd.s32 %v102_v37, %v96_v26  ;;  %vm105_vm8 = vc.u32 %v103_v35, %v99_v34  ;;  %v124_v51 = vsel %vm123_vm7, 1, %v768_v47  ;;  %v220_v59 = vor.u32 %v219_v43, %v218_v25 }
  0x37   :  { %v106_v53 = vsel %vm105_vm8, 1, %v768_v47  ;;  %v126_v54 = vadd.s32 %v124_v51, %v118_v36  ;;  %vm127_vm9 = vc.u32 %v125_v48, %v121_v44  ;;  %v224_v62 = vshll.u32 %v766_v41, %v807_v57 }
  0x38   :  { %v108_v56 = vadd.s32 %v106_v53, %v104_v49  ;;  %v128_v58 = vsel %vm127_vm9, 1, %v768_v47  ;;  %v225_v63 = vshrl.u32 %v767_v50, %v810_v1  ;;  %vm227_vm10 = vcmp.lt.s32.totalorder %v820_v9, 1 }
  0x39   :  { %v130_v61 = vadd.s32 %v128_v58, %v126_v54  ;;  %v845_v0 = vadd.s32 %v125_v48, %v121_v44  ;;  %v223_v2 = vor.u32 %v222_v60, %v221_v52  ;;  %vm229_vm11 = vcmp.lt.s32.totalorder %v820_v9, 3 }
  0x3a   :  { %v109_v39 = vadd.s32 %v108_v56, %v98_v32  ;;  %v226_v4 = vor.u32 %v225_v63, %v224_v62  ;;  %vm228_vm12 = vcmp.lt.s32.totalorder %v820_v9, 2  ;;  %vm230_vm13 = vcmp.lt.s32.totalorder %v820_v9, 4 }
  0x3b   :  { %v131_v3 = vadd.s32 %v130_v61, %v120_v42  ;;  %v235_v41 = vsel %vm227_vm10, %v828_v46, %v217_v55  ;;  %v236_v50 = vsel %vm230_vm13, %v223_v2, 920167782  ;;  %v244_v10 = vand.u32 65535, %v813_v5 }
  0x3c   :  { %v850_v7 = vadd.s32 %v109_v39, %v100_v38  ;;  %v237_v8 = vsel %vm229_vm11, %v220_v59, %v236_v50  ;;  %v245_v12 = vshrl.u32 %v813_v5, 16  ;;  %v133_v14 = vmul.u32 %v797_v28, %v816_v6 }
  0x3d   :  { %v132_v57 = vadd.s32 %v131_v3, %v122_v45  ;;  %v238_v16 = vsel %vm228_vm12, %v235_v41, %v237_v8  ;;  %v239_v17 = vsel %vm227_vm10, %v217_v55, %v220_v59  ;;  %v240_v20 = vsel %vm230_vm13, %v226_v4, 1326507024 }
  0x3e   :  { %vm135_vm14 = vc.u32 %v850_v7, %v845_v0  ;;  %v268_v21 = vand.u32 65535, %v238_v16  ;;  %v269_v22 = vshrl.u32 %v238_v16, 16  ;;  %v241_v23 = vsel %vm229_vm11, %v223_v2, %v240_v20 }
  0x3f   :  { %v136_v18 = vadd.s32 1, %v132_v57  ;;  %v242_v28 = vsel %vm228_vm12, %v239_v17, %v241_v23  ;;  %v211_v29 = vshrl.u32 %v762_v33, %v810_v1  ;;  %v232_v42 = vsel %vm230_vm13, %v220_v59, 2102212464 }
  0x40   :  { %v271_v6 = vmul.u32 %v269_v22, %v244_v10  ;;  %v246_v26 = vand.u32 65535, %v242_v28  ;;  %v247_v27 = vshrl.u32 %v242_v28, 16  ;;  %v270_v30 = vmul.u32 %v268_v21, %v244_v10 }
  0x41   :  { %v137_v24 = vsel %vm135_vm14, %v136_v18, %v132_v57  ;;  %v272_v31 = vmul.u32 %v268_v21, %v245_v12  ;;  %v273_v43 = vmul.u32 %v269_v22, %v245_v12  ;;  %v231_v1 = vsel %vm227_vm10, %v211_v29, %v828_v46 }
  0x42   :  { %v138_v25 = vadd.s32 %v137_v24, %v133_v14  ;;  %v274_v32 = vshll.u32 %v271_v6, 16  ;;  %v248_v36 = vmul.u32 %v246_v26, %v244_v10  ;;  %v249_v38 = vmul.u32 %v247_v27, %v244_v10 }
  0x43   :  { %v250_v40 = vmul.u32 %v246_v26, %v245_v12  ;;  %v276_v44 = vshll.u32 %v272_v31, 16  ;;  %v251_v45 = vmul.u32 %v247_v27, %v245_v12  ;;  %v233_v52 = vsel %vm229_vm11, %v217_v55, %v232_v42 }
  0x44   :  { %v139_v34 = vadd.s32 536870912, %v138_v25  ;;  %v252_v37 = vshll.u32 %v249_v38, 16  ;;  %vm278_vm15 = vc.u32 %v270_v30, %v274_v32  ;;  %v280_v49 = vadd.s32 %v274_v32, %v270_v30 }
  0x45   :  { %v254_v48 = vshll.u32 %v250_v40, 16  ;;  %v279_v54 = vsel %vm278_vm15, 1, %v768_v47  ;;  %v253_v58 = vshrl.u32 %v249_v38, 16  ;;  %v275_v61 = vshrl.u32 %v271_v6, 16 }
  0x46   :  { %v879_v35 = vshrl.u32 %v139_v34, 30  ;;  %vm256_vm0 = vc.u32 %v248_v36, %v252_v37  ;;  %v258_v51 = vadd.s32 %v252_v37, %v248_v36  ;;  %vm282_vm1 = vc.u32 %v280_v49, %v276_v44 }
  0x47   :  { %v257_v53 = vsel %vm256_vm0, 1, %v768_v47  ;;  %v281_v62 = vadd.s32 %v279_v54, %v273_v43  ;;  %v283_v46 = vsel %vm282_vm1, 1, %v768_v47  ;;  %v255_v39 = vshrl.u32 %v250_v40, 16 }
  0x48   :  { %v141_v33 = vshll.u32 %v879_v35, 30  ;;  %v259_v59 = vadd.s32 %v257_v53, %v251_v45  ;;  %vm260_vm2 = vc.u32 %v258_v51, %v254_v48  ;;  %v277_v55 = vshrl.u32 %v272_v31, 16 }
  0x49   :  { %v261_v60 = vsel %vm260_vm2, 1, %v768_v47  ;;  %v285_v3 = vadd.s32 %v283_v46, %v281_v62  ;;  %v284_v50 = vadd.s32 %v280_v49, %v276_v44  ;;  %v234_v8 = vsel %vm228_vm12, %v231_v1, %v233_v52 }
  0x4a   :  { %v142_v56 = vsub.s32 %v138_v25, %v141_v33  ;;  %v263_v2 = vadd.s32 %v261_v60, %v259_v59  ;;  %v288_v17 = vmul.u32 %v813_v5, %v234_v8  ;;  %v134_v47 = vadd.s32 %v845_v0, %v850_v7 }
  0x4b   :  { %v286_v10 = vadd.s32 %v285_v3, %v275_v61  ;;  %v164_v34 = vsub.s32 4, %v879_v35  ;;  %vm42_vm6 = vcmp.lt.s32.totalorder %v785_v11, 0  ;;  %vm41_vm8 = vcmp.le.f32.partialorder %v40_v13, 0.7853982 }
  0x4c   :  { %vm143_vm3 = vcmp.lt.s32.totalorder %v142_v56, 0  ;;  %v144_v63 = vsub.s32 0, %v142_v56  ;;  %v264_v41 = vadd.s32 %v263_v2, %v253_v58  ;;  %vm197_vm13 = vcmp.lt.s32.totalorder %v789_v15, 0 }
  0x4d   :  { %v287_v16 = vadd.s32 %v286_v10, %v277_v55  ;;  %v165_v44 = vsel %vm42_vm6, %v164_v34, %v879_v35  ;;  %vm183_vm1 = vweird.f32 %v785_v11  ;;  %vm196_vm2 = vcmp.le.f32.partialorder %v195_v19, 0.7853982 }
  0x4e   :  { %v145_v4 = vsel %vm143_vm3, %v144_v63, %v142_v56  ;;  %v265_v12 = vadd.s32 %v264_v41, %v255_v39  ;;  %v167_v49 = vsel %vm41_vm8, 0, %v165_v44 }
  0x4f   :  { %v146_v57 = vclz %v145_v4  ;;  %v291_v18 = vadd.s32 1, %v287_v16  ;;  %v184_v58 = vadd.s32 3, %v167_v49  ;;  %v496_v3 = vand.u32 3, %v167_v49 }
  0x50   :  { %vm290_vm4 = vc.u32 %v265_v12, %v284_v50  ;;  %v289_v51 = vadd.s32 %v284_v50, %v265_v12 }
  0x51   :  { %v682_v14 = vadd.s32 4294967294, %v146_v57  ;;  %v292_v24 = vsel %vm290_vm4, %v291_v18, %v287_v16  ;;  %v185_v2 = vand.u32 3, %v184_v58  ;;  %vm501_vm11 = vcmp.eq.s32.totalorder %v496_v3, 2 }
  0x52   :  { %v293_v28 = vadd.s32 %v292_v24, %v288_v17  ;;  %vm498_vm15 = vcmp.eq.s32.totalorder %v496_v3, 0  ;;  %vm497_vm0 = vcmp.lt.s32.totalorder %v496_v3, 2 }
  0x53   :  { %vm683_vm5 = vcmp.lt.s32.totalorder %v682_v14, 0  ;;  %vm190_vm10 = vcmp.eq.s32.totalorder %v185_v2, 2  ;;  %vm186_vm12 = vcmp.lt.s32.totalorder %v185_v2, 2  ;;  %vm187_vm14 = vcmp.eq.s32.totalorder %v185_v2, 0 }
  0x54   :  { %v149_v20 = vsel %vm683_vm5, 0, %v682_v14  ;;  %v294_v25 = vadd.s32 536870912, %v293_v28 }
  0x55   :  { %v150_v21 = vsub.s32 32, %v149_v20  ;;  %v151_v22 = vshll.u32 %v142_v56, %v149_v20  ;;  %v154_v23 = vsub.s32 4294967266, %v149_v20 }
  0x56   :  { %v896_v29 = vshrl.u32 %v294_v25, 30 }
  0x57   :  { %v152_v9 = vshrl.u32 %v134_v47, %v150_v21  ;;  %v155_v6 = vadd.s32 127, %v154_v23 }
  0x58   :  { %v296_v31 = vshll.u32 %v896_v29, 30  ;;  %v319_v47 = vsub.s32 4, %v896_v29 }
  0x59   :  { %v153_v26 = vor.u32 %v152_v9, %v151_v22  ;;  %v156_v27 = vshll.u32 %v155_v6, 23 }
  0x5a   :  { %v297_v7 = vsub.s32 %v293_v28, %v296_v31 }
  0x5b   :  { %v157_v5 = vor.u32 4788187, %v156_v27  ;;  %v160_v30 = vcvt.s32.f32 %v153_v26  ;;  %v320_v26 = vsel %vm197_vm13, %v319_v47, %v896_v29 }
  0x5c   :  { %vm298_vm7 = vcmp.lt.s32.totalorder %v297_v7, 0  ;;  %v299_v36 = vsub.s32 0, %v297_v7  ;;  %v322_v19 = vsel %vm196_vm2, 0, %v320_v26 }
  0x5d   :  { %v158_v0 = vand.u32 2147483647, %v157_v5  ;;  %v650_v44 = vand.u32 3, %v322_v19 }
  0x5e   :  { %v300_v40 = vsel %vm298_vm7, %v299_v36, %v297_v7 }
  0x5f   :  { %v161_v32 = vmul.f32 %v160_v30, %v158_v0  ;;  %v301_v45 = vclz %v300_v40  ;;  %vm655_vm4 = vcmp.eq.s32.totalorder %v650_v44, 2  ;;  %vm652_vm7 = vcmp.eq.s32.totalorder %v650_v44, 0 }
  0x61   :  { %v162_v38 = vxor.u32 2147483648, %v161_v32  ;;  %v685_v43 = vadd.s32 4294967294, %v301_v45 }
  0x63   :  { %v163_v42 = vsel %vm42_vm6, %v162_v38, %v161_v32  ;;  %vm686_vm9 = vcmp.lt.s32.totalorder %v685_v43, 0  ;;  %v339_v32 = vadd.s32 3, %v322_v19 }
  0x64   :  { %v166_v37 = vsel %vm41_vm8, %v785_v11, %v163_v42  ;;  %v304_v52 = vsel %vm686_vm9, 0, %v685_v43  ;;  %vm651_vm8 = vcmp.lt.s32.totalorder %v650_v44, 2  ;;  %vm338_vm9 = vweird.f32 %v789_v15 }
  0x65   :  { %v168_v48 = vmul.f32 %v166_v37, %v166_v37  ;;  %v305_v56 = vsub.s32 32, %v304_v52  ;;  %v306_v13 = vshll.u32 %v297_v7, %v304_v52  ;;  %v309_v59 = vsub.s32 4294967266, %v304_v52 }
  0x66   :  { %v340_v42 = vand.u32 3, %v339_v32 }
  0x67   :  { %v169_v33 = vmul.f32 -0.001358992, %v168_v48  ;;  %v176_v1 = vmul.f32 -0.00019511016, %v168_v48  ;;  %v307_v35 = vshrl.u32 %v289_v51, %v305_v56  ;;  %v310_v62 = vadd.s32 127, %v309_v59 }
  0x68   :  { %vm345_vm3 = vcmp.eq.s32.totalorder %v340_v42, 2  ;;  %vm341_vm5 = vcmp.lt.s32.totalorder %v340_v42, 2  ;;  %vm342_vm6 = vcmp.eq.s32.totalorder %v340_v42, 0 }
  0x69   :  { %v170_v53 = vadd.f32 0.041655596, %v169_v33  ;;  %v177_v54 = vadd.f32 0.008332121, %v176_v1  ;;  %v308_v39 = vor.u32 %v307_v35, %v306_v13  ;;  %v311_v55 = vshll.u32 %v310_v62, 23 }
  0x6b   :  { %v171_v60 = vmul.f32 %v170_v53, %v168_v48  ;;  %v178_v61 = vmul.f32 %v177_v54, %v168_v48  ;;  %v312_v50 = vor.u32 4788187, %v311_v55  ;;  %v315_v57 = vcvt.s32.f32 %v308_v39 }
  0x6d   :  { %v172_v46 = vadd.f32 -0.4999988, %v171_v60  ;;  %v179_v63 = vadd.f32 -0.16666654, %v178_v61  ;;  %v313_v12 = vand.u32 2147483647, %v312_v50 }
  0x6f   :  { %v173_v4 = vmul.f32 %v172_v46, %v168_v48  ;;  %v180_v41 = vmul.f32 %v179_v63, %v168_v48  ;;  %v316_v17 = vmul.f32 %v315_v57, %v313_v12 }
  0x71   :  { %v174_v8 = vadd.f32 1.0, %v173_v4  ;;  %v181_v10 = vadd.f32 1.0, %v180_v41  ;;  %v317_v22 = vxor.u32 2147483648, %v316_v17 }
  0x73   :  { %v182_v14 = vmul.f32 %v181_v10, %v166_v37  ;;  %v191_v16 = vxor.u32 2147483648, %v174_v8  ;;  %v318_v9 = vsel %vm197_vm13, %v317_v22, %v316_v17 }
  0x74   :  { %v321_v27 = vsel %vm196_vm2, %v789_v15, %v318_v9 }
  0x75   :  { %v188_v18 = vxor.u32 2147483648, %v182_v14  ;;  %v192_v20 = vsel %vm190_vm10, %v191_v16, %v182_v14  ;;  %v503_v21 = vsel %vm501_vm11, %v191_v16, %v182_v14  ;;  %v323_v5 = vmul.f32 %v321_v27, %v321_v27 }
  0x77   :  { %v189_v23 = vsel %vm187_vm14, %v174_v8, %v188_v18  ;;  %v500_v24 = vsel %vm498_vm15, %v174_v8, %v188_v18  ;;  %v324_v30 = vmul.f32 -0.001358992, %v323_v5  ;;  %v331_v31 = vmul.f32 -0.00019511016, %v323_v5 }
  0x78   :  { %v193_v28 = vsel %vm186_vm12, %v189_v23, %v192_v20  ;;  %v504_v6 = vsel %vm497_vm0, %v500_v24, %v503_v21 }
  0x79   :  { %v194_v25 = vsel %vm183_vm1, nan, %v193_v28  ;;  %v505_v11 = vsel %vm183_vm1, nan, %v504_v6  ;;  %v325_v0 = vadd.f32 0.041655596, %v324_v30  ;;  %v332_v7 = vadd.f32 0.008332121, %v331_v31 }
  0x7a   :  { %350 = vst [vmem:[#allocation5] sm:$0xff] %v194_v25 }
  0x7b   :  { %660 = vst [vmem:[#allocation5 + $0x10] sm:$0xff] %v505_v11  ;;  %v326_v34 = vmul.f32 %v325_v0, %v323_v5  ;;  %v333_v36 = vmul.f32 %v332_v7, %v323_v5 }
  0x7d   :  { %v327_v38 = vadd.f32 -0.4999988, %v326_v34  ;;  %v334_v40 = vadd.f32 -0.16666654, %v333_v36 }
  0x7f   :  { %v328_v45 = vmul.f32 %v327_v38, %v323_v5  ;;  %v335_v29 = vmul.f32 %v334_v40, %v323_v5 }
  0x81   :  { %v329_v37 = vadd.f32 1.0, %v328_v45  ;;  %v336_v48 = vadd.f32 1.0, %v335_v29 }
  0x83   :  { %v337_v43 = vmul.f32 %v336_v48, %v321_v27  ;;  %v346_v49 = vxor.u32 2147483648, %v329_v37 }
  0x85   :  { %v343_v33 = vxor.u32 2147483648, %v337_v43  ;;  %v347_v1 = vsel %vm345_vm3, %v346_v49, %v337_v43  ;;  %v657_v51 = vsel %vm655_vm4, %v346_v49, %v337_v43 }
  0x87   :  { %v344_v52 = vsel %vm342_vm6, %v329_v37, %v343_v33  ;;  %v654_v53 = vsel %vm652_vm7, %v329_v37, %v343_v33 }
  0x88   :  { %v348_v54 = vsel %vm341_vm5, %v344_v52, %v347_v1  ;;  %v658_v56 = vsel %vm651_vm8, %v654_v53, %v657_v51 }
  0x89   :  { %v349_v13 = vsel %vm338_vm9, nan, %v348_v54  ;;  %v659_v58 = vsel %vm338_vm9, nan, %v658_v56 }
  0x8a   :  { %351 = vst [vmem:[#allocation5 + $0x8] sm:$0xff] %v349_v13 }
  0x8b   :  { %661 = vst [vmem:[#allocation5 + $0x18] sm:$0xff] %v659_v58 }
  0x8c   :  { %674 = dma.vmem_to_hbm [thread:$0]  %s667_s11, 512, %s669_s14, [#allocation4], %s770_s15, %s770_s15, %s771_s16  }
  0x8d   :  { %759 = dma.done.wait [#allocation4], 512  }
  0x8e   :  { %760 = vsyncadd [#allocation4], 4294966784 }
  0x8f   :  { %679 = vsyncpa [#allocation3], 1 }
  0x90   :  { %680 = vsyncpa [#allocation4], 1 }

</bundles_post_ra>
